<compile_context>
chip_gen: v5e
topology: v5e:2x2
jax: 0.10.0
libtpu: 0.0.40
codegen_flags: <defaults>
</compile_context>

<pallas_src>
import jax
import jax.numpy as jnp
from jax.experimental import pallas as pl
from jax.experimental.pallas import tpu as pltpu


def _identity_kernel(x_ref, o_ref):
    # Pure pass-through: copy the whole VMEM block to the (aliased) output.
    o_ref[...] = x_ref[...]


def dummy_transformer_block(x: jax.Array) -> jax.Array:
    """Pallas equivalent of DummyTransformerBlock.forward: returns x unchanged."""
    B, S, H = x.shape
    # Flatten to a sublane/lane-aligned 2D slab: (B*S, H) = (8, 768).
    # The reshape is free at the XLA level (layout plumbing only).
    x2 = x.reshape(B * S, H)

    y2 = pl.pallas_call(
        _identity_kernel,
        out_shape=jax.ShapeDtypeStruct(x2.shape, x2.dtype),
        # Whole-array blocks, explicitly resident in VMEM; no grid -> single
        # invocation, no pipelining overhead.
        in_specs=[pl.BlockSpec(memory_space=pltpu.MemorySpace.VMEM)],
        out_specs=pl.BlockSpec(memory_space=pltpu.MemorySpace.VMEM),
        # Identity: let the output alias the input buffer (no extra HBM write
        # target). Contents are unchanged, so this is always safe here.
        input_output_aliases={0: 0},
    )(x2)

    return y2.reshape(B, S, H)


if __name__ == "__main__":
    key = jax.random.PRNGKey(0)
    # Matches the module's example input: torch.rand(2, 4, 768)
    x = jax.random.uniform(key, (2, 4, 768), dtype=jnp.float32)

    y = dummy_transformer_block(x)
    jax.block_until_ready(y)

    assert y.shape == x.shape and y.dtype == x.dtype
    assert bool(jnp.array_equal(y, x))
    print("KERNEL_OK")
</pallas_src>

<mosaic_0001>
module attributes {stable_mosaic.version = 11 : i64} {
  func.func @_identity_kernel(%arg0: memref<8x768xf32, #tpu.memory_space<vmem>>, %arg1: memref<8x768xf32, #tpu.memory_space<vmem>>) attributes {dimension_semantics = [], scalar_prefetch = 0 : i64, scratch_operands = 0 : i64, tpu.core_type = #tpu.core_type<tc>} {
    %c0 = arith.constant 0 : index
    %c0_0 = arith.constant 0 : index
    %0 = vector.load %arg0[%c0, %c0_0] : memref<8x768xf32, #tpu.memory_space<vmem>>, vector<8x768xf32>
    %c0_1 = arith.constant 0 : index
    %c0_2 = arith.constant 0 : index
    %1 = vector.load %arg1[%c0_1, %c0_2] : memref<8x768xf32, #tpu.memory_space<vmem>>, vector<8x768xf32>
    tpu.vector_store %arg1[%c0_1, %c0_2], %0 {strides = array<i32>} : memref<8x768xf32, #tpu.memory_space<vmem>>, vector<8x768xf32>,
    return
  }
}

</mosaic_0001>

<bundles_post_ra>
// kernel: tpu_custom_call.1
= control target key start
LH: loop header
LB: loop body
LE: loop exit
PB: predicated region body
PF: predicated region fallthrough
CT: control target
= control target key end

     0   :  { %6 = vsyncpa [#allocation3], 0  ;;  %s124_s0 = inlined_call_operand.hbm [shape: f32[8,768], index: 0, kind: input, shape index: {}, may-alias: {0,1}]   ;;  %s125_s1 = inlined_call_operand.hbm [shape: f32[8,768], index: 1, kind: output, shape index: {}, may-alias: {0,1}]  }
   0x1   :  { %7 = vsyncpa [#allocation4], 0  ;;  %s13_s8 = sshll.u32 %s124_s0, 4  ;;  %s106_s9 = smov [#allocation2]   ;;  %s14_s8 = int_to_ptr.hbm [resolvable:$true] %s13_s8 }
   0x2   :  { %s15_s10 = sshll.u32 %s106_s9, 4  ;;  %s16_s10 = int_to_ptr.vmem [resolvable:$true] %s15_s10 }
   0x3   :  { %18 = dma.hbm_to_vmem [thread:$0]  %s14_s8, 768, %s16_s10, [#allocation3]  }
   0x4   :  { %102 = dma.done.wait [#allocation3], 768  }
   0x5   :  { %103 = vsyncadd [#allocation3], 4294966528  ;;  %v23_v0 = vld [vmem:[#allocation2] sm:$0xff]  ;;  %v24_v1 = vld [vmem:[#allocation2 + $0x8] sm:$0xff]  ;;  %s107_s11 = smov [#allocation5]   ;;  %s42_s15 = sshll.u32 %s125_s1, 4  ;;  %s43_s15 = int_to_ptr.hbm [resolvable:$true] %s42_s15 }
   0x6   :  { %v25_v2 = vld [vmem:[#allocation2 + $0x10] sm:$0xff]  ;;  %29 = vst [vmem:[#allocation5] sm:$0xff] %v23_v0  ;;  %v26_v3 = vld [vmem:[#allocation2 + $0x18] sm:$0xff]  ;;  %s40_s12 = sshll.u32 %s107_s11, 4  ;;  %v27_v4 = vld [vmem:[#allocation2 + $0x20] sm:$0xff]  ;;  %s41_s12 = int_to_ptr.vmem [resolvable:$true] %s40_s12 }
   0x7   :  { %30 = vst [vmem:[#allocation5 + $0x8] sm:$0xff] %v24_v1  ;;  %v28_v5 = vld [vmem:[#allocation2 + $0x28] sm:$0xff] }
   0x8   :  { %31 = vst [vmem:[#allocation5 + $0x10] sm:$0xff] %v25_v2 }
   0x9   :  { %32 = vst [vmem:[#allocation5 + $0x18] sm:$0xff] %v26_v3 }
   0xa   :  { %33 = vst [vmem:[#allocation5 + $0x20] sm:$0xff] %v27_v4 }
   0xb   :  { %34 = vst [vmem:[#allocation5 + $0x28] sm:$0xff] %v28_v5 }
   0xc   :  { %45 = dma.vmem_to_hbm [thread:$0]  %s41_s12, 768, %s43_s15, [#allocation4]  }
   0xd   :  { %104 = dma.done.wait [#allocation4], 768  }
   0xe   :  { %105 = vsyncadd [#allocation4], 4294966528 }
   0xf   :  { %50 = vsyncpa [#allocation3], 1 }
  0x10   :  { %51 = vsyncpa [#allocation4], 1 }

</bundles_post_ra>
